<compile_context>
chip_gen: v7x
topology: tpu7x:2x2x1
jax: 0.10.0
libtpu: 0.0.40
codegen_flags: <defaults>
</compile_context>

<pallas_src>
import functools

import jax
import jax.numpy as jnp
from jax.experimental import pallas as pl
from jax.experimental.pallas import tpu as pltpu


def _round_up(n, m):
    return ((n + m - 1) // m) * m


# ---------------------------------------------------------------------------
# Kernel
# ---------------------------------------------------------------------------
def _mlp_kernel(x_ref, w1_ref, b1_ref, w2_ref, b2_ref,
                w3_ref, b3_ref, w4_ref, b4_ref, o_ref):
    # In-kernel cast of the x tile to bf16 (no-op if x already arrives bf16).
    x = x_ref[...].astype(jnp.bfloat16)

    # fc1 + ReLU   (bf16 MXU matmul, f32 accumulation)
    h = jnp.dot(x, w1_ref[...], preferred_element_type=jnp.float32)
    h = jnp.maximum(h + b1_ref[...], 0.0)
    # dropout -> identity (eval mode)
    # fc2 + ReLU
    h = jnp.dot(h.astype(jnp.bfloat16), w2_ref[...],
                preferred_element_type=jnp.float32)
    h = jnp.maximum(h + b2_ref[...], 0.0)
    # fc3 + ReLU
    h = jnp.dot(h.astype(jnp.bfloat16), w3_ref[...],
                preferred_element_type=jnp.float32)
    h = jnp.maximum(h + b3_ref[...], 0.0)
    # fc4 (lane-padded to 128 logits; padded lanes carry -1e30 bias)
    logits = jnp.dot(h.astype(jnp.bfloat16), w4_ref[...],
                     preferred_element_type=jnp.float32)
    logits = logits + b4_ref[...]
    # log_softmax over the last axis (padded lanes contribute exp(-huge) == 0)
    m = jnp.max(logits, axis=-1, keepdims=True)
    shifted = logits - m
    lse = jnp.log(jnp.sum(jnp.exp(shifted), axis=-1, keepdims=True))
    o_ref[...] = (shifted - lse).astype(o_ref.dtype)


# ---------------------------------------------------------------------------
# One-time parameter preparation (bf16 casts + fc4 lane padding)
# ---------------------------------------------------------------------------
def prepare_params(params):
    """params = (w1, b1, w2, b2, w3, b3, w4, b4) with w: (in, out), b: (1, out).
    Returns kernel-ready tuple: bf16 weights, f32 biases, fc4 padded to 128."""
    w1, b1, w2, b2, w3, b3, w4, b4 = params
    w4p = jnp.zeros((32, 128), jnp.float32).at[:, :10].set(w4.astype(jnp.float32))
    b4p = jnp.full((1, 128), -1e30, jnp.float32).at[:, :10].set(b4.astype(jnp.float32))
    to_bf16 = lambda w: w.astype(jnp.bfloat16)
    return (to_bf16(w1), b1.astype(jnp.float32),
            to_bf16(w2), b2.astype(jnp.float32),
            to_bf16(w3), b3.astype(jnp.float32),
            to_bf16(w4p), b4p)


# ---------------------------------------------------------------------------
# Forward wrapper
# ---------------------------------------------------------------------------
def _simple_nn_forward(x, prepared_params, *, batch_tile=2048, min_grid_steps=2):
    """x: (B, 1, 28, 28) or any shape reshapeable to (-1, 784), float dtype
    (bf16 input is cheapest). Returns (B, 10) bf16 log-probs."""
    w1b, b1, w2b, b2, w3b, b3, w4b, b4p = prepared_params

    x2d = x.reshape(-1, 784)
    if not jnp.issubdtype(x2d.dtype, jnp.floating):
        x2d = x2d.astype(jnp.float32)
    B = x2d.shape[0]

    # Batch tile: multiple of 8 (sublane), <= batch_tile, and small enough to
    # give >= min_grid_steps grid steps (keeps both v7x TensorCores busy).
    B8 = _round_up(B, 8)
    tb_cap = _round_up(pl.cdiv(B8, min_grid_steps), 8)
    TB = max(8, min(batch_tile, tb_cap))
    Bp = _round_up(B, TB)
    if Bp != B:
        x2d = jnp.pad(x2d, ((0, Bp - B), (0, 0)))

    args = (x2d, w1b, b1, w2b, b2, w3b, b3, w4b, b4p)

    def const_spec(shape):
        # Constant index_map -> weights/biases stay resident across grid steps.
        return pl.BlockSpec(shape, lambda i: (0, 0))

    in_specs = [
        pl.BlockSpec((TB, 784), lambda i: (i, 0)),   # x tile (pipelined)
        const_spec((784, 128)), const_spec((1, 128)),
        const_spec((128, 64)),  const_spec((1, 64)),
        const_spec((64, 32)),   const_spec((1, 32)),
        const_spec((32, 128)),  const_spec((1, 128)),
    ]
    out_spec = pl.BlockSpec((TB, 128), lambda i: (i, 0))

    param_bytes = sum(int(p.size) * p.dtype.itemsize
                      for p in (w1b, b1, w2b, b2, w3b, b3, w4b, b4p))
    cost = pl.CostEstimate(
        flops=2 * Bp * (784 * 128 + 128 * 64 + 64 * 32 + 32 * 128),
        transcendentals=Bp * 129,                        # exp (128 lanes) + log
        bytes_accessed=Bp * 784 * x2d.dtype.itemsize     # x read
        + Bp * 128 * 2                                   # bf16 logits write
        + param_bytes,
    )

    out = pl.pallas_call(
        _mlp_kernel,
        out_shape=jax.ShapeDtypeStruct((Bp, 128), jnp.bfloat16),
        grid_spec=pltpu.PrefetchScalarGridSpec(
            num_scalar_prefetch=0,
            grid=(Bp // TB,),
            in_specs=in_specs,
            out_specs=out_spec,
        ),
        compiler_params=pltpu.CompilerParams(
            dimension_semantics=("parallel",),
            vmem_limit_bytes=40 * 1024 * 1024,
        ),
        cost_estimate=cost,
    )(*args)

    return out[:B, :10]


simple_nn_forward = jax.jit(
    _simple_nn_forward, static_argnames=("batch_tile", "min_grid_steps"))


# ---------------------------------------------------------------------------
# Reference + init
# ---------------------------------------------------------------------------
def init_params(key):
    """PyTorch nn.Linear-style init (uniform +/- 1/sqrt(fan_in)).
    Weights stored transposed: (in, out). Biases as (1, out)."""
    dims = [(784, 128), (128, 64), (64, 32), (32, 10)]
    params = []
    for (fan_in, fan_out) in dims:
        key, kw, kb = jax.random.split(key, 3)
        bound = 1.0 / (fan_in ** 0.5)
        w = jax.random.uniform(kw, (fan_in, fan_out), jnp.float32, -bound, bound)
        b = jax.random.uniform(kb, (1, fan_out), jnp.float32, -bound, bound)
        params.extend([w, b])
    return tuple(params)


def _ref_forward(x, params):
    w1, b1, w2, b2, w3, b3, w4, b4 = params
    h = x.reshape(-1, 784).astype(jnp.float32)
    h = jnp.maximum(h @ w1 + b1, 0.0)
    h = jnp.maximum(h @ w2 + b2, 0.0)
    h = jnp.maximum(h @ w3 + b3, 0.0)
    logits = h @ w4 + b4
    return jax.nn.log_softmax(logits, axis=-1)


if __name__ == "__main__":
    key = jax.random.PRNGKey(0)
    kx, kp = jax.random.split(key)
    # Small MNIST-like batch: NCHW (2, 1, 28, 28)
    x = jax.random.normal(kx, (2, 1, 28, 28), dtype=jnp.float32)
    params = init_params(kp)
    prepared = prepare_params(params)

    out = simple_nn_forward(x, prepared)
    out = jax.block_until_ready(out)

    assert out.shape == (2, 10)
    out_f32 = out.astype(jnp.float32)
    assert bool(jnp.all(jnp.isfinite(out_f32)))

    # log_softmax rows should sum (in prob space) to ~1 (bf16 tolerance)
    row_sums = jnp.sum(jnp.exp(out_f32), axis=1)
    assert bool(jnp.all(jnp.abs(row_sums - 1.0) < 5e-2))

    # Compare against a pure-JAX f32 reference (bf16 matmul/output tolerance)
    ref = _ref_forward(x, params)
    max_err = jnp.max(jnp.abs(out_f32 - ref))
    assert bool(max_err < 0.1), f"max_err={max_err}"

    print("KERNEL_OK")
</pallas_src>

<mosaic_0001>
module attributes {stable_mosaic.version = 11 : i64} {
  func.func @_mlp_kernel(%arg0: i32, %arg1: memref<8x784xf32, #tpu.memory_space<vmem>>, %arg2: memref<784x128xbf16, #tpu.memory_space<vmem>>, %arg3: memref<1x128xf32, #tpu.memory_space<vmem>>, %arg4: memref<128x64xbf16, #tpu.memory_space<vmem>>, %arg5: memref<1x64xf32, #tpu.memory_space<vmem>>, %arg6: memref<64x32xbf16, #tpu.memory_space<vmem>>, %arg7: memref<1x32xf32, #tpu.memory_space<vmem>>, %arg8: memref<32x128xbf16, #tpu.memory_space<vmem>>, %arg9: memref<1x128xf32, #tpu.memory_space<vmem>>, %arg10: memref<8x128xbf16, #tpu.memory_space<vmem>>) attributes {dimension_semantics = [#tpu.dimension_semantics<parallel>], iteration_bounds = array<i64: 1>, scalar_prefetch = 0 : i64, scratch_operands = 0 : i64, tpu.core_type = #tpu.core_type<tc>, window_params = [{transform_indices = @transform_0, window_bounds = array<i64: 8, 784>}, {pipeline_mode = #tpu.pipeline_mode<synchronous>, transform_indices = @transform_1, window_bounds = array<i64: 784, 128>}, {pipeline_mode = #tpu.pipeline_mode<synchronous>, transform_indices = @transform_2, window_bounds = array<i64: 1, 128>}, {pipeline_mode = #tpu.pipeline_mode<synchronous>, transform_indices = @transform_3, window_bounds = array<i64: 128, 64>}, {pipeline_mode = #tpu.pipeline_mode<synchronous>, transform_indices = @transform_4, window_bounds = array<i64: 1, 64>}, {pipeline_mode = #tpu.pipeline_mode<synchronous>, transform_indices = @transform_5, window_bounds = array<i64: 64, 32>}, {pipeline_mode = #tpu.pipeline_mode<synchronous>, transform_indices = @transform_6, window_bounds = array<i64: 1, 32>}, {pipeline_mode = #tpu.pipeline_mode<synchronous>, transform_indices = @transform_7, window_bounds = array<i64: 32, 128>}, {pipeline_mode = #tpu.pipeline_mode<synchronous>, transform_indices = @transform_8, window_bounds = array<i64: 1, 128>}, {transform_indices = @transform_9, window_bounds = array<i64: 8, 128>}]} {
    %c0 = arith.constant 0 : index
    %c0_0 = arith.constant 0 : index
    %0 = vector.load %arg1[%c0, %c0_0] : memref<8x784xf32, #tpu.memory_space<vmem>>, vector<8x784xf32>
    %1 = arith.truncf %0 : vector<8x784xf32> to vector<8x784xbf16>
    %c0_1 = arith.constant 0 : index
    %c0_2 = arith.constant 0 : index
    %2 = vector.load %arg2[%c0_1, %c0_2] : memref<784x128xbf16, #tpu.memory_space<vmem>>, vector<784x128xbf16>
    %cst = arith.constant dense<0.000000e+00> : vector<8x128xf32>
    %3 = tpu.matmul %1, %2, %cst {dimension_numbers = #tpu.dot_dimension_numbers<[1], [0], [0], [1], [0, 0, 1, 1], [], []>} : vector<8x784xbf16>, vector<784x128xbf16>, vector<8x128xf32> -> vector<8x128xf32>
    %c0_3 = arith.constant 0 : index
    %c0_4 = arith.constant 0 : index
    %4 = vector.load %arg3[%c0_3, %c0_4] : memref<1x128xf32, #tpu.memory_space<vmem>>, vector<1x128xf32>
    %5 = vector.broadcast %4 : vector<1x128xf32> to vector<8x128xf32>
    %6 = arith.addf %3, %5 : vector<8x128xf32>
    %cst_5 = arith.constant 0.000000e+00 : f32
    %7 = vector.broadcast %cst_5 : f32 to vector<8x128xf32>
    %8 = arith.maximumf %6, %7 : vector<8x128xf32>
    %9 = arith.truncf %8 : vector<8x128xf32> to vector<8x128xbf16>
    %c0_6 = arith.constant 0 : index
    %c0_7 = arith.constant 0 : index
    %10 = vector.load %arg4[%c0_6, %c0_7] : memref<128x64xbf16, #tpu.memory_space<vmem>>, vector<128x64xbf16>
    %cst_8 = arith.constant dense<0.000000e+00> : vector<8x64xf32>
    %11 = tpu.matmul %9, %10, %cst_8 {dimension_numbers = #tpu.dot_dimension_numbers<[1], [0], [0], [1], [0, 0, 1, 1], [], []>} : vector<8x128xbf16>, vector<128x64xbf16>, vector<8x64xf32> -> vector<8x64xf32>
    %c0_9 = arith.constant 0 : index
    %c0_10 = arith.constant 0 : index
    %12 = vector.load %arg5[%c0_9, %c0_10] : memref<1x64xf32, #tpu.memory_space<vmem>>, vector<1x64xf32>
    %13 = vector.broadcast %12 : vector<1x64xf32> to vector<8x64xf32>
    %14 = arith.addf %11, %13 : vector<8x64xf32>
    %cst_11 = arith.constant 0.000000e+00 : f32
    %15 = vector.broadcast %cst_11 : f32 to vector<8x64xf32>
    %16 = arith.maximumf %14, %15 : vector<8x64xf32>
    %17 = arith.truncf %16 : vector<8x64xf32> to vector<8x64xbf16>
    %c0_12 = arith.constant 0 : index
    %c0_13 = arith.constant 0 : index
    %18 = vector.load %arg6[%c0_12, %c0_13] : memref<64x32xbf16, #tpu.memory_space<vmem>>, vector<64x32xbf16>
    %cst_14 = arith.constant dense<0.000000e+00> : vector<8x32xf32>
    %19 = tpu.matmul %17, %18, %cst_14 {dimension_numbers = #tpu.dot_dimension_numbers<[1], [0], [0], [1], [0, 0, 1, 1], [], []>} : vector<8x64xbf16>, vector<64x32xbf16>, vector<8x32xf32> -> vector<8x32xf32>
    %c0_15 = arith.constant 0 : index
    %c0_16 = arith.constant 0 : index
    %20 = vector.load %arg7[%c0_15, %c0_16] : memref<1x32xf32, #tpu.memory_space<vmem>>, vector<1x32xf32>
    %21 = vector.broadcast %20 : vector<1x32xf32> to vector<8x32xf32>
    %22 = arith.addf %19, %21 : vector<8x32xf32>
    %cst_17 = arith.constant 0.000000e+00 : f32
    %23 = vector.broadcast %cst_17 : f32 to vector<8x32xf32>
    %24 = arith.maximumf %22, %23 : vector<8x32xf32>
    %25 = arith.truncf %24 : vector<8x32xf32> to vector<8x32xbf16>
    %c0_18 = arith.constant 0 : index
    %c0_19 = arith.constant 0 : index
    %26 = vector.load %arg8[%c0_18, %c0_19] : memref<32x128xbf16, #tpu.memory_space<vmem>>, vector<32x128xbf16>
    %cst_20 = arith.constant dense<0.000000e+00> : vector<8x128xf32>
    %27 = tpu.matmul %25, %26, %cst_20 {dimension_numbers = #tpu.dot_dimension_numbers<[1], [0], [0], [1], [0, 0, 1, 1], [], []>} : vector<8x32xbf16>, vector<32x128xbf16>, vector<8x128xf32> -> vector<8x128xf32>
    %c0_21 = arith.constant 0 : index
    %c0_22 = arith.constant 0 : index
    %28 = vector.load %arg9[%c0_21, %c0_22] : memref<1x128xf32, #tpu.memory_space<vmem>>, vector<1x128xf32>
    %29 = vector.broadcast %28 : vector<1x128xf32> to vector<8x128xf32>
    %30 = arith.addf %27, %29 : vector<8x128xf32>
    %cst_23 = arith.constant dense<0xFF800000> : vector<8xf32>
    %31 = vector.multi_reduction <maximumf>, %30, %cst_23 [1] : vector<8x128xf32> to vector<8xf32>
    %32 = vector.shape_cast %31 : vector<8xf32> to vector<8x1xf32>
    %33 = vector.broadcast %32 : vector<8x1xf32> to vector<8x128xf32>
    %34 = arith.subf %30, %33 : vector<8x128xf32>
    %35 = math.exp %34 : vector<8x128xf32>
    %cst_24 = arith.constant dense<0.000000e+00> : vector<8xf32>
    %36 = vector.multi_reduction <add>, %35, %cst_24 [1] : vector<8x128xf32> to vector<8xf32>
    %37 = vector.shape_cast %36 : vector<8xf32> to vector<8x1xf32>
    %38 = math.log %37 : vector<8x1xf32>
    %39 = vector.broadcast %38 : vector<8x1xf32> to vector<8x128xf32>
    %40 = arith.subf %34, %39 : vector<8x128xf32>
    %41 = arith.truncf %40 : vector<8x128xf32> to vector<8x128xbf16>
    %c0_25 = arith.constant 0 : index
    %c0_26 = arith.constant 0 : index
    %42 = vector.load %arg10[%c0_25, %c0_26] : memref<8x128xbf16, #tpu.memory_space<vmem>>, vector<8x128xbf16>
    tpu.vector_store %arg10[%c0_25, %c0_26], %41 {strides = array<i32>} : memref<8x128xbf16, #tpu.memory_space<vmem>>, vector<8x128xbf16>,
    return
  }
  func.func @transform_0(%arg0: i32) -> (i32, i32) {
    %c0_i32 = arith.constant 0 : i32
    %c0_i32_0 = arith.constant 0 : i32
    return %arg0, %c0_i32 : i32, i32
  }
  func.func @transform_1(%arg0: i32) -> (i32, i32) {
    %c0_i32 = arith.constant 0 : i32
    %c0_i32_0 = arith.constant 0 : i32
    %c0_i32_1 = arith.constant 0 : i32
    return %c0_i32, %c0_i32_0 : i32, i32
  }
  func.func @transform_2(%arg0: i32) -> (i32, i32) {
    %c0_i32 = arith.constant 0 : i32
    %c0_i32_0 = arith.constant 0 : i32
    %c0_i32_1 = arith.constant 0 : i32
    return %c0_i32, %c0_i32_0 : i32, i32
  }
  func.func @transform_3(%arg0: i32) -> (i32, i32) {
    %c0_i32 = arith.constant 0 : i32
    %c0_i32_0 = arith.constant 0 : i32
    %c0_i32_1 = arith.constant 0 : i32
    return %c0_i32, %c0_i32_0 : i32, i32
  }
  func.func @transform_4(%arg0: i32) -> (i32, i32) {
    %c0_i32 = arith.constant 0 : i32
    %c0_i32_0 = arith.constant 0 : i32
    %c0_i32_1 = arith.constant 0 : i32
    return %c0_i32, %c0_i32_0 : i32, i32
  }
  func.func @transform_5(%arg0: i32) -> (i32, i32) {
    %c0_i32 = arith.constant 0 : i32
    %c0_i32_0 = arith.constant 0 : i32
    %c0_i32_1 = arith.constant 0 : i32
    return %c0_i32, %c0_i32_0 : i32, i32
  }
  func.func @transform_6(%arg0: i32) -> (i32, i32) {
    %c0_i32 = arith.constant 0 : i32
    %c0_i32_0 = arith.constant 0 : i32
    %c0_i32_1 = arith.constant 0 : i32
    return %c0_i32, %c0_i32_0 : i32, i32
  }
  func.func @transform_7(%arg0: i32) -> (i32, i32) {
    %c0_i32 = arith.constant 0 : i32
    %c0_i32_0 = arith.constant 0 : i32
    %c0_i32_1 = arith.constant 0 : i32
    return %c0_i32, %c0_i32_0 : i32, i32
  }
  func.func @transform_8(%arg0: i32) -> (i32, i32) {
    %c0_i32 = arith.constant 0 : i32
    %c0_i32_0 = arith.constant 0 : i32
    %c0_i32_1 = arith.constant 0 : i32
    return %c0_i32, %c0_i32_0 : i32, i32
  }
  func.func @transform_9(%arg0: i32) -> (i32, i32) {
    %c0_i32 = arith.constant 0 : i32
    %c0_i32_0 = arith.constant 0 : i32
    return %arg0, %c0_i32 : i32, i32
  }
}

</mosaic_0001>

<bundles_post_ra>
// kernel: _simple_nn_forward.1
= control target key start
LH: loop header
LB: loop body
LE: loop exit
PB: predicated region body
PF: predicated region fallthrough
CT: control target
= control target key end

     0   :  { %14 = vsyncpa [#allocation3], 0  ;;  %s1205_s30 = smov [#allocation2]   ;;  %s1514_s0 = inlined_call_operand.vmem [shape: f32[8,784], index: 0, kind: input, shape index: {}]   ;;  %s1515_s1 = inlined_call_operand.vmem [shape: bf16[784,128], index: 1, kind: input, shape index: {}]   ;;  %s1516_s2 = inlined_call_operand.vmem [shape: f32[1,128], index: 2, kind: input, shape index: {}]   ;;  %s1517_s3 = inlined_call_operand.vmem [shape: bf16[128,64], index: 3, kind: input, shape index: {}]   ;;  %s1518_s4 = inlined_call_operand.vmem [shape: f32[1,64], index: 4, kind: input, shape index: {}]   ;;  %s1519_s5 = inlined_call_operand.vmem [shape: bf16[64,32], index: 5, kind: input, shape index: {}]   ;;  %s1520_s6 = inlined_call_operand.vmem [shape: f32[1,32], index: 6, kind: input, shape index: {}]   ;;  %s1521_s7 = inlined_call_operand.hbm [shape: bf16[32,128], index: 7, kind: input, shape index: {}]   ;;  %s1522_s8 = inlined_call_operand.vmem [shape: f32[1,128], index: 8, kind: input, shape index: {}]   ;;  %s1523_s9 = inlined_call_operand.vmem [shape: bf16[8,128], index: 9, kind: output, shape index: {}]  }
   0x1   :  { %s34_s10 = sshll.u32 %s1205_s30, 4  ;;  %s1181_s13 = scalar_lea.hbm %s1521_s7, 256  ;;  %s35_s10 = int_to_ptr.vmem [resolvable:$true] %s34_s10 }
   0x2   :  { %p1182_p0 = scmp.ne.s32.totalorder %s1521_s7, %s1181_s13  ;;  %p1185_p1 = scmp.lt.u32.totalorder %s1181_s13, %s1521_s7 }
   0x4   :  { %p1187_p2 = pnand %p1185_p1, %p1182_p0 }
   0x6   :  { %1190 = shalt.err (!%p1187_p2)
}
   0x7   :  { %s1191_s18 = scalar_lea.vmem %s35_s10, 256  ;;  %p1196_p4 = scmp.lt.s32.totalorder %s35_s10, %s35_s10 }
   0x8   :  { %p1192_p3 = scmp.ne.s32.totalorder %s35_s10, %s1191_s18  ;;  %p1197_p5 = scmp.lt.s32.totalorder %s1191_s18, %s1191_s18 }
   0xa   :  { %p1198_p6 = por %p1197_p5, %p1196_p4 }
   0xc   :  { %p1199_p7 = pnand %p1198_p6, %p1192_p3 }
   0xe   :  { %1202 = shalt.err (!%p1199_p7)
}
   0xf   :  { %s1206_s19 = smov 64   ;;  %s1207_s20 = smov 4  }
  0x10   :  { %40 = dma.hbm_to_vmem [thread:$0]  %s1521_s7, 256, %s35_s10, [#allocation3], %s1206_s19, %s1206_s19, %s1207_s20  }
  0x11   :  { %1203 = dma.done.wait [#allocation3], 256  }
  0x12   :  { %1204 = vsyncadd [#allocation3], 4294967040  ;;  %v1114_v0 = vld [vmem:[%s1515_s1 + $0x40] sm:$0xff]   ;;  %v1118_v4 = vld [vmem:[%s1515_s1 + $0x48] sm:$0xff]   ;;  %v1208_v44 = vmov 0.0   ;;  %vm1209_vm0 = vmmov 0  }
  0x13   :  { %v1115_v1 = vld [vmem:[%s1515_s1] sm:$0xff]   ;;  %978 = vmatprep.subr.bf16.mxu0 %v1114_v0  ;;  %v1119_v5 = vld [vmem:[%s1515_s1 + $0x8] sm:$0xff]   ;;  %v1122_v8 = vld [vmem:[%s1515_s1 + $0x50] sm:$0xff]   ;;  %vm460_vm1 = vcmask 130048   ;;  %vm778_vm2 = vcmask 523264   ;;  %vm847_vm3 = vcmask 261120  }
  0x14   :  { %v1116_v2 = vld [vmem:[%s1515_s1 + $0xc0] sm:$0xff]   ;;  %979 = vmatpush3.bf16.msra.mxu0 %v1115_v1  ;;  %v1120_v6 = vld [vmem:[%s1515_s1 + $0xc8] sm:$0xff]   ;;  %v1123_v9 = vld [vmem:[%s1515_s1 + $0x10] sm:$0xff]  }
  0x15   :  { %v1117_v3 = vld [vmem:[%s1515_s1 + $0x80] sm:$0xff]   ;;  %1000 = vmatprep.subr.bf16.mxu1 %v1116_v2  ;;  %980 = vmatprep.subr.bf16.mxu0 %v1118_v4  ;;  %v1121_v7 = vld [vmem:[%s1515_s1 + $0x88] sm:$0xff]   ;;  %v1124_v10 = vld [vmem:[%s1515_s1 + $0xd0] sm:$0xff]  }
  0x16   :  { %1001 = vmatpush3.bf16.msra.mxu1 %v1117_v3  ;;  %v1125_v11 = vld [vmem:[%s1515_s1 + $0x90] sm:$0xff]   ;;  %v1126_v12 = vld [vmem:[%s1515_s1 + $0x58] sm:$0xff]   ;;  %v1130_v16 = vld [vmem:[%s1515_s1 + $0x60] sm:$0xff]  }
  0x17   :  { %1002 = vmatprep.subr.bf16.mxu1 %v1120_v6  ;;  %v1127_v13 = vld [vmem:[%s1515_s1 + $0x18] sm:$0xff]   ;;  %v1131_v17 = vld [vmem:[%s1515_s1 + $0x20] sm:$0xff]   ;;  %v1134_v20 = vld [vmem:[%s1515_s1 + $0x68] sm:$0xff]  }
  0x18   :  { %981 = vmatpush3.bf16.msra.mxu0 %v1119_v5  ;;  %v1128_v14 = vld [vmem:[%s1515_s1 + $0xd8] sm:$0xff]   ;;  %v1132_v18 = vld [vmem:[%s1515_s1 + $0xe0] sm:$0xff]   ;;  %v1135_v21 = vld [vmem:[%s1515_s1 + $0x28] sm:$0xff]  }
  0x19   :  { %982 = vmatprep.subr.bf16.mxu0 %v1122_v8  ;;  %v1129_v15 = vld [vmem:[%s1515_s1 + $0x98] sm:$0xff]   ;;  %v1133_v19 = vld [vmem:[%s1515_s1 + $0xa0] sm:$0xff]   ;;  %v1136_v22 = vld [vmem:[%s1515_s1 + $0xe8] sm:$0xff]  }
  0x1a   :  { %1003 = vmatpush3.bf16.msra.mxu1 %v1121_v7  ;;  %v1137_v23 = vld [vmem:[%s1515_s1 + $0xa8] sm:$0xff]   ;;  %v1138_v24 = vld [vmem:[%s1515_s1 + $0x70] sm:$0xff]   ;;  %v1142_v28 = vld [vmem:[%s1515_s1 + $0x78] sm:$0xff]  }
  0x1b   :  { %1004 = vmatprep.subr.bf16.mxu1 %v1124_v10  ;;  %v1139_v25 = vld [vmem:[%s1515_s1 + $0x30] sm:$0xff]   ;;  %v1143_v29 = vld [vmem:[%s1515_s1 + $0x38] sm:$0xff]   ;;  %v48_v31 = vld [vmem:[%s1514_s0 + $0x8] sm:$0xff] }
  0x1c   :  { %983 = vmatpush3.bf16.msra.mxu0 %v1123_v9  ;;  %v1140_v26 = vld [vmem:[%s1515_s1 + $0xf0] sm:$0xff]   ;;  %v1144_v30 = vld [vmem:[%s1515_s1 + $0xf8] sm:$0xff]   ;;  %v55_v32 = vpack.c.bf16 %v48_v31, %v48_v31  ;;  %v47_v34 = vld [vmem:[%s1514_s0] sm:$0xff] }
  0x1d   :  { %984 = vmatprep.subr.bf16.mxu0 %v1126_v12  ;;  %v1141_v27 = vld [vmem:[%s1515_s1 + $0xb0] sm:$0xff]   ;;  %v1145_v33 = vld [vmem:[%s1515_s1 + $0xb8] sm:$0xff]   ;;  %v54_v35 = vpack.c.bf16 %v47_v34, %v47_v34  ;;  %v1146_v36 = vld [vmem:[%s1515_s1 + $0x140] sm:$0xff]  }
  0x1e   :  { %1005 = vmatpush3.bf16.msra.mxu1 %v1125_v11  ;;  %v50_v37 = vld [vmem:[%s1514_s0 + $0x18] sm:$0xff]  ;;  %496 = vmatprep.mubr.bf16.mxu0 %v55_v32  ;;  %v1147_v39 = vld [vmem:[%s1515_s1 + $0x100] sm:$0xff]   ;;  %v49_v40 = vld [vmem:[%s1514_s0 + $0x10] sm:$0xff] }
  0x1f   :  { %1006 = vmatprep.subr.bf16.mxu1 %v1128_v14  ;;  %v57_v38 = vpack.c.bf16 %v50_v37, %v50_v37  ;;  %v56_v41 = vpack.c.bf16 %v49_v40, %v49_v40  ;;  %v1148_v42 = vld [vmem:[%s1515_s1 + $0x148] sm:$0xff]   ;;  %v1150_v45 = vld [vmem:[%s1515_s1 + $0x150] sm:$0xff]   ;;  %v1152_v47 = vld [vmem:[%s1515_s1 + $0x158] sm:$0xff]  }
  0x20   :  { %985 = vmatpush3.bf16.msra.mxu0 %v1127_v13  ;;  %v1149_v43 = vld [vmem:[%s1515_s1 + $0x108] sm:$0xff]   ;;  %v1151_v46 = vld [vmem:[%s1515_s1 + $0x110] sm:$0xff]   ;;  %v1153_v48 = vld [vmem:[%s1515_s1 + $0x118] sm:$0xff]  }
  0x21   :  { %986 = vmatprep.subr.bf16.mxu0 %v1130_v16  ;;  %536 = vmatprep.mubr.bf16.mxu1 %v57_v38  ;;  %v1154_v49 = vld [vmem:[%s1515_s1 + $0x160] sm:$0xff]   ;;  %v1156_v51 = vld [vmem:[%s1515_s1 + $0x168] sm:$0xff]   ;;  %v1158_v55 = vld [vmem:[%s1515_s1 + $0x170] sm:$0xff]  }
  0x22   :  { %1007 = vmatpush3.bf16.msra.mxu1 %v1129_v15  ;;  %v1155_v50 = vld [vmem:[%s1515_s1 + $0x120] sm:$0xff]   ;;  %v1157_v52 = vld [vmem:[%s1515_s1 + $0x128] sm:$0xff]   ;;  %v53_v57 = vld [vmem:[%s1514_s0 + $0x30] sm:$0xff] }
  0x23   :  { %1008 = vmatprep.subr.bf16.mxu1 %v1132_v18  ;;  %v1162_v53 = vld [vmem:[%s1515_s1 + $0x180] sm:$0xff]   ;;  %v52_v54 = vld [vmem:[%s1514_s0 + $0x28] sm:$0xff]  ;;  %v60_v58 = vpack.c.bf16 %v53_v57, %v53_v57  ;;  %v1159_v59 = vld [vmem:[%s1515_s1 + $0x130] sm:$0xff]  }
  0x24   :  { %987 = vmatpush3.bf16.msra.mxu0 %v1131_v17  ;;  %v59_v56 = vpack.c.bf16 %v52_v54, %v52_v54  ;;  %v1160_v60 = vld [vmem:[%s1515_s1 + $0x178] sm:$0xff]   ;;  %v51_v62 = vld [vmem:[%s1514_s0 + $0x20] sm:$0xff]  ;;  %v1164_v1 = vld [vmem:[%s1517_s3 + $0x8] sm:$0xff]  }
  0x25   :  { %988 = vmatprep.subr.bf16.mxu0 %v1134_v20  ;;  %v1161_v61 = vld [vmem:[%s1515_s1 + $0x138] sm:$0xff]   ;;  %v58_v63 = vpack.c.bf16 %v51_v62, %v51_v62  ;;  %v1163_v0 = vld [vmem:[%s1517_s3] sm:$0xff]   ;;  %v1165_v2 = vld [vmem:[%s1517_s3 + $0x10] sm:$0xff]  }
  0x26   :  { %1009 = vmatpush3.bf16.msra.mxu1 %v1133_v19  ;;  %v1166_v3 = vld [vmem:[%s1517_s3 + $0x18] sm:$0xff]   ;;  %v1167_v4 = vld [vmem:[%s1517_s3 + $0x20] sm:$0xff]   ;;  %v1168_v5 = vld [vmem:[%s1517_s3 + $0x28] sm:$0xff]  }
  0x27   :  { %1010 = vmatprep.subr.bf16.mxu1 %v1136_v22  ;;  %v1169_v6 = vld [vmem:[%s1517_s3 + $0x30] sm:$0xff]   ;;  %v1170_v7 = vld [vmem:[%s1517_s3 + $0x38] sm:$0xff]   ;;  %v1171_v8 = vld [vmem:[%s1519_s5] sm:$0xff]  }
  0x28   :  { %989 = vmatpush3.bf16.msra.mxu0 %v1135_v21  ;;  %v1172_v9 = vld [vmem:[%s1519_s5 + $0x8] sm:$0xff]   ;;  %v908_v11 = vld [vmem:[%s1516_s2] ss:$0 sm:$0xff]  ;;  %v1174_v37 = vld [vmem:[%s1519_s5 + $0x18] sm:$0xff]  }
  0x29   :  { %990 = vmatprep.subr.bf16.mxu0 %v1138_v24  ;;  %v1175_v38 = vld [vmem:[#allocation2] sm:$0xff]  }
  0x2a   :  { %1011 = vmatpush3.bf16.msra.mxu1 %v1137_v23 }
  0x2b   :  { %1012 = vmatprep.subr.bf16.mxu1 %v1140_v26 }
  0x2c   :  { %991 = vmatpush3.bf16.msra.mxu0 %v1139_v25 }
  0x2d   :  { %992 = vmatprep.subr.bf16.mxu0 %v1142_v28 }
  0x2e   :  { %1013 = vmatpush3.bf16.msra.mxu1 %v1141_v27 }
  0x2f   :  { %1014 = vmatprep.subr.bf16.mxu1 %v1144_v30 }
  0x30   :  { %993 = vmatpush3.bf16.msra.mxu0 %v1143_v29 }
  0x31   :  { %1022 = vmatprep.subr.bf16.mxu0 %v1146_v36  ;;  %v1173_v36 = vld [vmem:[%s1519_s5 + $0x10] sm:$0xff]  }
  0x32   :  { %1015 = vmatpush3.bf16.msra.mxu1 %v1145_v33 }
  0x33   :  { %497 = vmatmul.mubr.bf16.vlgmr.msra.gmra.mrb[0].mxu0 %v54_v35  ;;  %1063 = vmatprep.subr.bf16.mxu1 %v1208_v44 }
  0x34   :  { %1023 = vmatpush3.bf16.msra.mxu0 %v1147_v39  ;;  %576 = vmatprep.mubr.bf16.mxu0 %v59_v56  ;;  %v959_v39 = vld [vmem:[%s1518_s4] ss:$0 sm:$0xff] }
  0x35   :  { %537 = vmatmul.mubr.bf16.vlgmr.msra.gmra.mrb[0].mxu1 %v56_v41  ;;  %1024 = vmatprep.subr.bf16.mxu0 %v1148_v42  ;;  %v974_v56 = vld [vmem:[%s1522_s8] ss:$0 sm:$0xff] }
  0x36   :  { %1065 = vmatprep.mubr.msk.bf16.mxu1 %vm1209_vm0, %v1208_v44  ;;  %1064 = vmatpush3.bf16.msra.mxu1 %v1162_v53 }
  0x37   :  { %1069 = vmatprep.subr.bf16.mxu1 %v1208_v44 }
  0x38   :  { %1025 = vmatpush3.bf16.msra.mxu0 %v1149_v43 }
  0x39   :  { %1026 = vmatprep.subr.bf16.mxu0 %v1150_v45 }
  0x3c   :  { %1027 = vmatpush3.bf16.msra.mxu0 %v1151_v46 }
  0x3d   :  { %1028 = vmatprep.subr.bf16.mxu0 %v1152_v47  ;;  %1066 = vmatmul.mubr.msk.bf16.vlgmr.msra.gmra.mrb[4].mxu1 %vm460_vm1, %v60_v58 }
  0x3e   :  { %1085 = vmatprep.mubr.msk.bf16.mxu1 %vm1209_vm0, %v1208_v44  ;;  %1070 = vmatpush3.bf16.msra.mxu1 %v1163_v0 }
  0x3f   :  { %1071 = vmatprep.subr.bf16.mxu1 %v1208_v44 }
  0x40   :  { %1029 = vmatpush3.bf16.msra.mxu0 %v1153_v48  ;;  %v1176_v48 = vld [vmem:[#allocation2 + $0x8] sm:$0xff]  }
  0x41   :  { %1030 = vmatprep.subr.bf16.mxu0 %v1154_v49  ;;  %v968_v49 = vld [vmem:[%s1520_s6] ss:$0 sm:$0xff] }
  0x42   :  { %1072 = vmatpush3.bf16.msra.mxu1 %v1164_v1 }
  0x43   :  { %1073 = vmatprep.subr.bf16.mxu1 %v1208_v44 }
  0x44   :  { %1031 = vmatpush3.bf16.msra.mxu0 %v1155_v50 }
  0x45   :  { %1032 = vmatprep.subr.bf16.mxu0 %v1156_v51 }
  0x46   :  { %1074 = vmatpush3.bf16.msra.mxu1 %v1165_v2 }
  0x47   :  { %1075 = vmatprep.subr.bf16.mxu1 %v1208_v44 }
  0x48   :  { %1033 = vmatpush3.bf16.msra.mxu0 %v1157_v52 }
  0x49   :  { %1034 = vmatprep.subr.bf16.mxu0 %v1158_v55 }
  0x4a   :  { %1076 = vmatpush3.bf16.msra.mxu1 %v1166_v3 }
  0x4b   :  { %1077 = vmatprep.subr.bf16.mxu1 %v1208_v44 }
  0x4c   :  { %1035 = vmatpush3.bf16.msra.mxu0 %v1159_v59 }
  0x4d   :  { %1036 = vmatprep.subr.bf16.mxu0 %v1160_v60 }
  0x4e   :  { %1078 = vmatpush3.bf16.msra.mxu1 %v1167_v4 }
  0x4f   :  { %1079 = vmatprep.subr.bf16.mxu1 %v1208_v44 }
  0x50   :  { %1037 = vmatpush3.bf16.msra.mxu0 %v1161_v61 }
  0x51   :  { %1089 = vmatprep.subr.bf16.mxu0 %v1208_v44 }
  0x52   :  { %1080 = vmatpush3.bf16.msra.mxu1 %v1168_v5 }
  0x53   :  { %577 = vmatmul.mubr.bf16.vlgmr.msra.gmra.mrb[4].mxu0 %v58_v63  ;;  %1081 = vmatprep.subr.bf16.mxu1 %v1208_v44 }
  0x54   :  { %1097 = vmatprep.mubr.msk.bf16.mxu0 %vm1209_vm0, %v1208_v44  ;;  %1090 = vmatpush3.bf16.msra.mxu0 %v1171_v8 }
  0x55   :  { %1091 = vmatprep.subr.bf16.mxu0 %v1208_v44 }
  0x56   :  { %1082 = vmatpush3.bf16.msra.mxu1 %v1169_v6 }
  0x57   :  { %1083 = vmatprep.subr.bf16.mxu1 %v1208_v44 }
  0x58   :  { %1092 = vmatpush3.bf16.msra.mxu0 %v1172_v9 }
  0x59   :  { %1093 = vmatprep.subr.bf16.mxu0 %v1208_v44 }
  0x5a   :  { %1084 = vmatpush3.bf16.msra.mxu1 %v1170_v7 }
  0x5b   :  { %1101 = vmatprep.subr.bf16.mxu1 %v1208_v44 }
  0x5c   :  { %1094 = vmatpush3.bf16.msra.mxu0 %v1173_v36 }
  0x5d   :  { %1095 = vmatprep.subr.bf16.mxu0 %v1208_v44 }
  0x60   :  { %1096 = vmatpush3.bf16.msra.mxu0 %v1174_v37 }
 0x106   :  { %v994_v10 = vpop.f32.mrb[0].mxu0 }
 0x107   :  { %v995_v12 = vpop.f32.mrb[1].mxu0 }
 0x108   :  { %v996_v13 = vadd.f32 %v995_v12, %v994_v10  ;;  %v997_v14 = vpop.f32.mrb[2].mxu0  ;;  %v1016_v15 = vpop.f32.mrb[0].mxu1 }
 0x109   :  { %v998_v16 = vpop.f32.mrb[3].mxu0  ;;  %v1017_v18 = vpop.f32.mrb[1].mxu1 }
 0x10a   :  { %v499_v17 = vadd.f32 %v996_v13, %v908_v11  ;;  %v1018_v19 = vadd.f32 %v1017_v18, %v1016_v15  ;;  %v1019_v20 = vpop.f32.mrb[2].mxu1 }
 0x10b   :  { %v1020_v21 = vpop.f32.mrb[3].mxu1 }
 0x10c   :  { %v539_v22 = vadd.f32 %v1018_v19, %v499_v17 }
 0x110   :  { %v618_v23 = vpop.f32.mrb[4].mxu1 }
 0x111   :  { %v1067_v24 = vpop.f32.mrb[5].mxu1 }
 0x112   :  { %v621_v25 = vpop.f32.mrb[6].mxu1 }
 0x113   :  { %v1068_v26 = vpop.f32.mrb[7].mxu1 }
 0x126   :  { %v1038_v27 = vpop.f32.mrb[4].mxu0 }
 0x127   :  { %v1039_v28 = vpop.f32.mrb[5].mxu0 }
 0x128   :  { %v1040_v29 = vadd.f32 %v1039_v28, %v1038_v27  ;;  %v1041_v30 = vpop.f32.mrb[6].mxu0 }
 0x129   :  { %v1042_v31 = vpop.f32.mrb[7].mxu0 }
 0x12a   :  { %v579_v32 = vadd.f32 %v1040_v29, %v539_v22 }
 0x12c   :  { %v619_v33 = vadd.f32 %v618_v23, %v579_v32 }
 0x12e   :  { %v624_v34 = vmax.f32 %v619_v33, 0.0 }
 0x130   :  { %v625_v35 = vpack.c.bf16 %v624_v34, %v624_v34 }
 0x132   :  { %1086 = vmatmul.mubr.bf16.vlgmr.msra.gmra.mrb[8].mxu1 %v625_v35 }
 0x133   :  { %1105 = vmatprep.mubr.msk.bf16.mxu1 %vm1209_vm0, %v1208_v44  ;;  %1102 = vmatpush3.bf16.msra.mxu1 %v1175_v38 }
 0x134   :  { %1103 = vmatprep.subr.bf16.mxu1 %v1208_v44 }
 0x137   :  { %1104 = vmatpush3.bf16.msra.mxu1 %v1176_v48 }
 0x205   :  { %v731_v40 = vpop.f32.mrb[8].mxu1 }
 0x206   :  { %v732_v41 = vadd.f32 %v959_v39, %v731_v40  ;;  %v1087_v42 = vpop.f32.mrb[9].mxu1 }
 0x207   :  { %v734_v43 = vpop.f32.mrb[10].mxu1 }
 0x208   :  { %v737_v45 = vmax.f32 %v732_v41, 0.0  ;;  %v1088_v46 = vpop.f32.mrb[11].mxu1 }
 0x20a   :  { %v738_v47 = vpack.c.bf16 %v737_v45, %v737_v45 }
 0x20c   :  { %1098 = vmatmul.mubr.msk.bf16.vlgmr.msra.gmra.mrb[8].mxu0 %vm778_vm2, %v738_v47 }
 0x2df   :  { %v816_v44 = vpop.f32.mrb[8].mxu0 }
 0x2e0   :  { %v817_v50 = vadd.f32 %v968_v49, %v816_v44  ;;  %v1099_v51 = vpop.f32.mrb[9].mxu0 }
 0x2e1   :  { %v819_v52 = vpop.f32.mrb[10].mxu0 }
 0x2e2   :  { %v822_v53 = vmax.f32 %v817_v50, 0.0  ;;  %v1100_v54 = vpop.f32.mrb[11].mxu0 }
 0x2e4   :  { %v823_v55 = vpack.c.bf16 %v822_v53, %v822_v53 }
 0x2e6   :  { %1106 = vmatmul.mubr.msk.bf16.vlgmr.msra.gmra.mrb[12].mxu1 %vm847_vm3, %v823_v55 }
 0x3b9   :  { %v885_v57 = vpop.f32.mrb[12].mxu1 }
 0x3ba   :  { %v886_v58 = vadd.f32 %v974_v56, %v885_v57  ;;  %v1107_v59 = vpop.f32.mrb[13].mxu1 }
 0x3bb   :  { %v888_v60 = vpop.f32.mrb[14].mxu1 }
 0x3bc   :  { %891 = vmax.xlane.f32.xlu0 %v886_v58  ;;  %v1108_v61 = vpop.f32.mrb[15].mxu1 }
 0x449   :  { %v892_v62 = vpop.xlane.xlu0 %891 }
 0x44a   :  { %v893_v63 = vsub.f32 %v886_v58, %v892_v62 }
 0x44c   :  { %v894_v0 = vmul.f32 1.442695, %v893_v63 }
 0x44e   :  { %1177 = vpow2.f32 %v894_v0 }
 0x458   :  { %v1178_v1 = vpop.eup %1177 }
 0x459   :  { %896 = vadd.xlane.f32.xlu0 %v1178_v1 }
 0x4e6   :  { %v897_v2 = vpop.xlane.xlu0 %896 }
 0x4e7   :  { %1179 = vlog2.f32 %v897_v2 }
 0x4f1   :  { %v1180_v3 = vpop.eup %1179 }
 0x4f2   :  { %v899_v4 = vmul.f32 0.6931472, %v1180_v3 }
 0x4f4   :  { %v900_v5 = vsub.f32 %v893_v63, %v899_v4 }
 0x4f6   :  { %v901_v6 = vpack.c.bf16 %v900_v5, %v900_v5 }
 0x4f8   :  { %902 = vst [vmem:[%s1523_s9] sm:$0xf] %v901_v6 }
 0x4f9   :  { %907 = vsyncpa [#allocation3], 1 }

</bundles_post_ra>
